<compile_context>
chip_gen: v5e
topology: v5e:2x2
jax: 0.10.0
libtpu: 0.0.40
codegen_flags: <defaults>
</compile_context>

<pallas_src>
import jax
import jax.numpy as jnp
from jax.experimental import pallas as pl
from jax.experimental.pallas import tpu as pltpu

_TARGET_BLOCK_BYTES = 4 * 1024 * 1024   # ~4 MiB per block (in+out double-buffered
                                        # => ~16 MiB VMEM worst case).


def _copy_kernel(x_ref, o_ref):
    # Pure identity copy of the current (block_rows, lane) tile.
    o_ref[...] = x_ref[...]


def _sublane_multiple(dtype):
    # Native packed sublane tile: 8 rows for 4-byte, 16 for 2-byte, 32 for 1-byte.
    return {4: 8, 2: 16, 1: 32}.get(jnp.dtype(dtype).itemsize, 8)


def _choose_lane(total, last_dim):
    # Prefer a lane-dense (multiple-of-128) last dim chosen from divisors of the
    # total element count (full flatten is a free reshape of a contiguous array).
    for lane in (512, 256, 128):
        if total % lane == 0:
            return lane
    # Fallback: keep x's own last dim as the lane dim (block uses the full
    # extent, so it is legal even when < 128).  Slightly masked stores, but
    # zero extra HBM passes — no pad, no slice.
    return last_dim


def median_pool2d_forward(x, kernel_size=3, stride=1, padding=0, same=False):
    """Forward pass of MedianPool2d — exactly `return x` per the reference
    module.  kernel_size/stride/padding/same are accepted for signature parity
    but are unused by the reference forward()."""
    # TODO(synk): the module defines median-pool parameters but its forward()
    # never uses them; a true median filter would need an unfold + sort/median
    # Pallas kernel.
    del kernel_size, stride, padding, same

    # Degenerate inputs: the reference forward is identity, so pass through.
    if x.ndim == 0 or x.size == 0:
        return x

    orig_shape = x.shape
    total = int(x.size)
    itemsize = jnp.dtype(x.dtype).itemsize
    sub = _sublane_multiple(x.dtype)

    lane = _choose_lane(total, int(orig_shape[-1]))
    rows = total // lane
    bytes_per_row = lane * itemsize

    # Pathological shape guard (huge non-128-divisible last dim): even a minimal
    # block would blow VMEM.  The reference forward is identity, so just return.
    if bytes_per_row * max(1, min(rows, sub)) > 12 * 1024 * 1024:
        return x

    if rows <= sub:
        # Tiny slab: use the full row extent (legal: equals the array dim).
        block_rows = rows
    else:
        max_rows = max(sub, (_TARGET_BLOCK_BYTES // bytes_per_row) // sub * sub)
        block_rows = min((rows // sub) * sub, max_rows)

    slab = x.reshape(rows, lane)          # free metadata reshape (contiguous)
    grid = (pl.cdiv(rows, block_rows),)   # partial final block is masked by Pallas

    out = pl.pallas_call(
        _copy_kernel,
        out_shape=jax.ShapeDtypeStruct((rows, lane), x.dtype),
        grid=grid,
        in_specs=[pl.BlockSpec((block_rows, lane), lambda i: (i, 0))],
        out_specs=pl.BlockSpec((block_rows, lane), lambda i: (i, 0)),
        compiler_params=pltpu.CompilerParams(
            # Shards row-blocks across v7x's 2 TensorCores; no-op on v5e/v6e.
            dimension_semantics=("parallel",),
            # Raise v5e's 16 MiB scoped default so 4 x 4 MiB buffers fit with
            # headroom; 32 MiB is already the default on v6e/v7x.
            vmem_limit_bytes=32 * 1024 * 1024,
        ),
        cost_estimate=pl.CostEstimate(
            flops=0, transcendentals=0, bytes_accessed=2 * total * itemsize),
    )(slab)

    return out.reshape(orig_shape)


if __name__ == "__main__":
    key = jax.random.PRNGKey(0)
    # Small NCHW input consistent with an image-filter module.
    x = jax.random.normal(key, (2, 4, 16, 16), dtype=jnp.float32)

    y = median_pool2d_forward(x, kernel_size=3, stride=1, padding=0, same=False)
    y = jax.block_until_ready(y)

    # Reference forward is identity.
    assert y.shape == x.shape
    assert y.dtype == x.dtype
    assert bool(jnp.allclose(y, x))

    print("KERNEL_OK")
</pallas_src>

<mosaic_0001>
module attributes {stable_mosaic.version = 11 : i64} {
  func.func @_copy_kernel(%arg0: i32, %arg1: memref<4x512xf32, #tpu.memory_space<vmem>>, %arg2: memref<4x512xf32, #tpu.memory_space<vmem>>) attributes {dimension_semantics = [#tpu.dimension_semantics<parallel>], iteration_bounds = array<i64: 1>, scalar_prefetch = 0 : i64, scratch_operands = 0 : i64, tpu.core_type = #tpu.core_type<tc>, window_params = [{transform_indices = @transform_0, window_bounds = array<i64: 4, 512>}, {transform_indices = @transform_1, window_bounds = array<i64: 4, 512>}]} {
    %c0 = arith.constant 0 : index
    %c0_0 = arith.constant 0 : index
    %0 = vector.load %arg1[%c0, %c0_0] : memref<4x512xf32, #tpu.memory_space<vmem>>, vector<4x512xf32>
    %c0_1 = arith.constant 0 : index
    %c0_2 = arith.constant 0 : index
    %1 = vector.load %arg2[%c0_1, %c0_2] : memref<4x512xf32, #tpu.memory_space<vmem>>, vector<4x512xf32>
    tpu.vector_store %arg2[%c0_1, %c0_2], %0 {strides = array<i32>} : memref<4x512xf32, #tpu.memory_space<vmem>>, vector<4x512xf32>,
    return
  }
  func.func @transform_0(%arg0: i32) -> (i32, i32) {
    %c0_i32 = arith.constant 0 : i32
    %c0_i32_0 = arith.constant 0 : i32
    return %arg0, %c0_i32 : i32, i32
  }
  func.func @transform_1(%arg0: i32) -> (i32, i32) {
    %c0_i32 = arith.constant 0 : i32
    %c0_i32_0 = arith.constant 0 : i32
    return %arg0, %c0_i32 : i32, i32
  }
}

</mosaic_0001>

<bundles_post_ra>
// kernel: tpu_custom_call.1
= control target key start
LH: loop header
LB: loop body
LE: loop exit
PB: predicated region body
PF: predicated region fallthrough
CT: control target
= control target key end

     0   :  { %6 = vsyncpa [#allocation3], 0  ;;  %s116_s0 = inlined_call_operand.hbm [shape: f32[4,512], index: 0, kind: input, shape index: {}]   ;;  %s117_s1 = inlined_call_operand.hbm [shape: f32[4,512], index: 1, kind: output, shape index: {}]  }
   0x1   :  { %7 = vsyncpa [#allocation4], 0  ;;  %s13_s8 = sshll.u32 %s116_s0, 4  ;;  %s98_s9 = smov [#allocation2]   ;;  %s14_s8 = int_to_ptr.hbm [resolvable:$true] %s13_s8 }
   0x2   :  { %s15_s10 = sshll.u32 %s98_s9, 4  ;;  %s16_s10 = int_to_ptr.vmem [resolvable:$true] %s15_s10 }
   0x3   :  { %18 = dma.hbm_to_vmem [thread:$0]  %s14_s8, 256, %s16_s10, [#allocation3]  }
   0x4   :  { %94 = dma.done.wait [#allocation3], 256  }
   0x5   :  { %95 = vsyncadd [#allocation3], 4294967040  ;;  %s99_s11 = smov [#allocation5]   ;;  %s34_s15 = sshll.u32 %s117_s1, 4  ;;  %v23_v0 = vld [vmem:[#allocation2] sm:$0xff]  ;;  %v24_v1 = vld [vmem:[#allocation2 + $0x8] sm:$0xff]  ;;  %s35_s15 = int_to_ptr.hbm [resolvable:$true] %s34_s15 }
   0x6   :  { %s32_s12 = sshll.u32 %s99_s11, 4  ;;  %25 = vst [vmem:[#allocation5] sm:$0xff] %v23_v0  ;;  %s33_s12 = int_to_ptr.vmem [resolvable:$true] %s32_s12 }
   0x7   :  { %26 = vst [vmem:[#allocation5 + $0x8] sm:$0xff] %v24_v1 }
   0x8   :  { %37 = dma.vmem_to_hbm [thread:$0]  %s33_s12, 256, %s35_s15, [#allocation4]  }
   0x9   :  { %96 = dma.done.wait [#allocation4], 256  }
   0xa   :  { %97 = vsyncadd [#allocation4], 4294967040 }
   0xb   :  { %42 = vsyncpa [#allocation3], 1 }
   0xc   :  { %43 = vsyncpa [#allocation4], 1 }

</bundles_post_ra>
